<compile_context>
chip_gen: v7x
topology: tpu7x:2x2x1
jax: 0.10.0
libtpu: 0.0.40
codegen_flags: <defaults>
</compile_context>

<pallas_src>
import numpy as np
import jax
import jax.numpy as jnp
from jax.experimental import pallas as pl
from jax.experimental.pallas import tpu as pltpu


# Tap order (dy, dx) == (ky-1, kx-1), matching the (ky, kx)-major weight layout.
_TAPS = tuple((dy, dx) for dy in (-1, 0, 1) for dx in (-1, 0, 1))


def _tap_masks(N, H, W):
    """(9, N*H*W) 0/1 masks realizing zero 'same' padding for each 3x3 tap."""
    L = N * H * W
    j = np.arange(L)
    xj = j % W
    yj = (j // W) % H
    rows = []
    for dy, dx in _TAPS:
        ok = ((xj + dx >= 0) & (xj + dx < W) & (yj + dy >= 0) & (yj + dy < H))
        rows.append(ok.astype(np.float32))
    return jnp.asarray(np.stack(rows, axis=0))


def resblock_pallas(x_nchw, params):
    N, C, H, W = x_nchw.shape
    L = N * H * W
    Cp = ((C + 7) // 8) * 8          # pad channels to the f32 sublane tile
    w1, b1, g1, be1, w2, b2, g2, be2 = params

    def pad_w(w):                    # (C,C,3,3) -> (Cp, 9*Cp), tap-major cols
        wp = jnp.zeros((Cp, Cp, 3, 3), jnp.float32).at[:C, :C].set(w)
        return jnp.transpose(wp, (0, 2, 3, 1)).reshape(Cp, 9 * Cp)

    def pad_vec(v):                  # (C,) -> (Cp, 1), zero padded
        return jnp.zeros((Cp, 1), jnp.float32).at[:C, 0].set(v)

    # NCHW -> (C, N*H*W): spatial on lanes.  API-boundary layout change only;
    # at realistic shapes prefer accepting a channel-major layout directly.
    x_cl = jnp.transpose(x_nchw, (1, 0, 2, 3)).reshape(C, L).astype(jnp.float32)
    x_p = jnp.zeros((Cp, L), jnp.float32).at[:C].set(x_cl)
    masks = _tap_masks(N, H, W)

    def kernel(x_ref, m_ref, w1_ref, b1_ref, g1_ref, be1_ref,
               w2_ref, b2_ref, g2_ref, be2_ref, out_ref, taps_ref):
        eps = 1e-5

        def conv(a, w_ref, b_ref):
            # 9 masked lane-shifts into the shared VMEM scratch ...
            for k, (dy, dx) in enumerate(_TAPS):
                s = dy * W + dx
                t = a if s == 0 else pltpu.roll(a, (-s) % L, axis=1)
                if dy != 0 or dx != 0:
                    t = t * m_ref[pl.ds(k, 1), :]
                taps_ref[pl.ds(k * Cp, Cp), :] = t
            # ... then one MXU contraction over (tap, cin), plus bias.
            return jnp.dot(w_ref[...], taps_ref[...],
                           preferred_element_type=jnp.float32) + b_ref[...]

        def bn(h, g_ref, be_ref):
            # training-mode BatchNorm2d folded into a single scale/shift FMA
            mean = jnp.mean(h, axis=1, keepdims=True)
            var = jnp.mean((h - mean) ** 2, axis=1, keepdims=True)
            scale = g_ref[...] * jax.lax.rsqrt(var + eps)
            shift = be_ref[...] - mean * scale
            return h * scale + shift

        x = x_ref[...]
        h = jnp.maximum(bn(conv(x, w1_ref, b1_ref), g1_ref, be1_ref), 0.0)
        h = bn(conv(h, w2_ref, b2_ref), g2_ref, be2_ref)
        out_ref[...] = jnp.maximum(x + h, 0.0)

    args = (x_p, masks, pad_w(w1), pad_vec(b1), pad_vec(g1), pad_vec(be1),
            pad_w(w2), pad_vec(b2), pad_vec(g2), pad_vec(be2))

    def full_spec(a):
        nd = a.ndim
        return pl.BlockSpec(a.shape, lambda i, nd=nd: (0,) * nd)

    grid_spec = pltpu.PrefetchScalarGridSpec(
        num_scalar_prefetch=0,
        grid=(1,),
        in_specs=[full_spec(a) for a in args],
        out_specs=pl.BlockSpec((Cp, L), lambda i: (0, 0)),
        scratch_shapes=[pltpu.VMEM((9 * Cp, L), jnp.float32)],
    )

    out_p = pl.pallas_call(
        kernel,
        out_shape=jax.ShapeDtypeStruct((Cp, L), jnp.float32),
        grid_spec=grid_spec,
        compiler_params=pltpu.CompilerParams(
            dimension_semantics=("arbitrary",)),
    )(*args)

    return jnp.transpose(out_p[:C].reshape(C, N, H, W), (1, 0, 2, 3))


def init_params(key, C):
    # Conv2d weights/biases (PyTorch shapes), BN affine params; deterministic.
    ks = jax.random.split(key, 8)
    bound = 1.0 / np.sqrt(C * 9)
    w1 = jax.random.uniform(ks[0], (C, C, 3, 3), jnp.float32, -bound, bound)
    b1 = jax.random.uniform(ks[1], (C,), jnp.float32, -bound, bound)
    w2 = jax.random.uniform(ks[2], (C, C, 3, 3), jnp.float32, -bound, bound)
    b2 = jax.random.uniform(ks[3], (C,), jnp.float32, -bound, bound)
    g1 = jax.random.uniform(ks[4], (C,), jnp.float32, 0.5, 1.5)
    be1 = jax.random.uniform(ks[5], (C,), jnp.float32, -0.5, 0.5)
    g2 = jax.random.uniform(ks[6], (C,), jnp.float32, 0.5, 1.5)
    be2 = jax.random.uniform(ks[7], (C,), jnp.float32, -0.5, 0.5)
    return (w1, b1, g1, be1, w2, b2, g2, be2)


def resblock_ref(x, params):
    # Pure-JAX reference mirroring PyTorch semantics (training-mode BN).
    w1, b1, g1, be1, w2, b2, g2, be2 = params
    eps = 1e-5

    def conv(h, w, b):
        y = jax.lax.conv_general_dilated(
            h, w, (1, 1), ((1, 1), (1, 1)),
            dimension_numbers=("NCHW", "OIHW", "NCHW"))
        return y + b[None, :, None, None]

    def bn(h, g, be):
        mean = jnp.mean(h, axis=(0, 2, 3), keepdims=True)
        var = jnp.mean((h - mean) ** 2, axis=(0, 2, 3), keepdims=True)
        return (h - mean) / jnp.sqrt(var + eps) * g[None, :, None, None] \
            + be[None, :, None, None]

    h = jax.nn.relu(bn(conv(x, w1, b1), g1, be1))
    h = bn(conv(h, w2, b2), g2, be2)
    return jax.nn.relu(x + h)


if __name__ == "__main__":
    key = jax.random.PRNGKey(0)
    kx, kp = jax.random.split(key)
    N, C, H, W = 2, 4, 16, 16
    x = jax.random.normal(kx, (N, C, H, W), jnp.float32)
    params = init_params(kp, C)

    out = resblock_pallas(x, params)
    out = jax.block_until_ready(out)

    ref = resblock_ref(x, params)
    assert out.shape == (N, C, H, W)
    np.testing.assert_allclose(np.asarray(out), np.asarray(ref), rtol=2e-3, atol=2e-3)

    print("KERNEL_OK")
</pallas_src>

<mosaic_0001>
module attributes {stable_mosaic.version = 11 : i64} {
  func.func @kernel(%arg0: i32, %arg1: memref<8x512xf32, #tpu.memory_space<vmem>>, %arg2: memref<9x512xf32, #tpu.memory_space<vmem>>, %arg3: memref<8x72xf32, #tpu.memory_space<vmem>>, %arg4: memref<8x1xf32, #tpu.memory_space<vmem>>, %arg5: memref<8x1xf32, #tpu.memory_space<vmem>>, %arg6: memref<8x1xf32, #tpu.memory_space<vmem>>, %arg7: memref<8x72xf32, #tpu.memory_space<vmem>>, %arg8: memref<8x1xf32, #tpu.memory_space<vmem>>, %arg9: memref<8x1xf32, #tpu.memory_space<vmem>>, %arg10: memref<8x1xf32, #tpu.memory_space<vmem>>, %arg11: memref<8x512xf32, #tpu.memory_space<vmem>>, %arg12: memref<72x512xf32, #tpu.memory_space<vmem>>) attributes {dimension_semantics = [#tpu.dimension_semantics<arbitrary>], iteration_bounds = array<i64: 1>, scalar_prefetch = 0 : i64, scratch_operands = 1 : i64, tpu.core_type = #tpu.core_type<tc>, window_params = [{pipeline_mode = #tpu.pipeline_mode<synchronous>, transform_indices = @transform_0, window_bounds = array<i64: 8, 512>}, {pipeline_mode = #tpu.pipeline_mode<synchronous>, transform_indices = @transform_1, window_bounds = array<i64: 9, 512>}, {pipeline_mode = #tpu.pipeline_mode<synchronous>, transform_indices = @transform_2, window_bounds = array<i64: 8, 72>}, {pipeline_mode = #tpu.pipeline_mode<synchronous>, transform_indices = @transform_3, window_bounds = array<i64: 8, 1>}, {pipeline_mode = #tpu.pipeline_mode<synchronous>, transform_indices = @transform_4, window_bounds = array<i64: 8, 1>}, {pipeline_mode = #tpu.pipeline_mode<synchronous>, transform_indices = @transform_5, window_bounds = array<i64: 8, 1>}, {pipeline_mode = #tpu.pipeline_mode<synchronous>, transform_indices = @transform_6, window_bounds = array<i64: 8, 72>}, {pipeline_mode = #tpu.pipeline_mode<synchronous>, transform_indices = @transform_7, window_bounds = array<i64: 8, 1>}, {pipeline_mode = #tpu.pipeline_mode<synchronous>, transform_indices = @transform_8, window_bounds = array<i64: 8, 1>}, {pipeline_mode = #tpu.pipeline_mode<synchronous>, transform_indices = @transform_9, window_bounds = array<i64: 8, 1>}, {pipeline_mode = #tpu.pipeline_mode<synchronous>, transform_indices = @transform_10, window_bounds = array<i64: 8, 512>}]} {
    %c0 = arith.constant 0 : index
    %c0_0 = arith.constant 0 : index
    %0 = vector.load %arg1[%c0, %c0_0] : memref<8x512xf32, #tpu.memory_space<vmem>>, vector<8x512xf32>
    %c17_i32 = arith.constant 17 : i32
    %1 = tpu.dynamic_rotate %0 by %c17_i32 dim 1 : vector<8x512xf32>, i32 -> vector<8x512xf32>
    %c0_1 = arith.constant 0 : index
    %c0_2 = arith.constant 0 : index
    %2 = vector.load %arg2[%c0_1, %c0_2] : memref<9x512xf32, #tpu.memory_space<vmem>>, vector<1x512xf32>
    %3 = vector.broadcast %2 : vector<1x512xf32> to vector<8x512xf32>
    %4 = arith.mulf %1, %3 : vector<8x512xf32>
    %c0_3 = arith.constant 0 : index
    %c0_4 = arith.constant 0 : index
    %5 = vector.load %arg12[%c0_3, %c0_4] : memref<72x512xf32, #tpu.memory_space<vmem>>, vector<8x512xf32>
    tpu.vector_store %arg12[%c0_3, %c0_4], %4 {strides = array<i32>} : memref<72x512xf32, #tpu.memory_space<vmem>>, vector<8x512xf32>,
    %c16_i32 = arith.constant 16 : i32
    %6 = tpu.dynamic_rotate %0 by %c16_i32 dim 1 : vector<8x512xf32>, i32 -> vector<8x512xf32>
    %c1 = arith.constant 1 : index
    %c0_5 = arith.constant 0 : index
    %7 = vector.load %arg2[%c1, %c0_5] : memref<9x512xf32, #tpu.memory_space<vmem>>, vector<1x512xf32>
    %8 = vector.broadcast %7 : vector<1x512xf32> to vector<8x512xf32>
    %9 = arith.mulf %6, %8 : vector<8x512xf32>
    %c8 = arith.constant 8 : index
    %c0_6 = arith.constant 0 : index
    %10 = vector.load %arg12[%c8, %c0_6] : memref<72x512xf32, #tpu.memory_space<vmem>>, vector<8x512xf32>
    tpu.vector_store %arg12[%c8, %c0_6], %9 {strides = array<i32>} : memref<72x512xf32, #tpu.memory_space<vmem>>, vector<8x512xf32>,
    %c15_i32 = arith.constant 15 : i32
    %11 = tpu.dynamic_rotate %0 by %c15_i32 dim 1 : vector<8x512xf32>, i32 -> vector<8x512xf32>
    %c2 = arith.constant 2 : index
    %c0_7 = arith.constant 0 : index
    %12 = vector.load %arg2[%c2, %c0_7] : memref<9x512xf32, #tpu.memory_space<vmem>>, vector<1x512xf32>
    %13 = vector.broadcast %12 : vector<1x512xf32> to vector<8x512xf32>
    %14 = arith.mulf %11, %13 : vector<8x512xf32>
    %c16 = arith.constant 16 : index
    %c0_8 = arith.constant 0 : index
    %15 = vector.load %arg12[%c16, %c0_8] : memref<72x512xf32, #tpu.memory_space<vmem>>, vector<8x512xf32>
    tpu.vector_store %arg12[%c16, %c0_8], %14 {strides = array<i32>} : memref<72x512xf32, #tpu.memory_space<vmem>>, vector<8x512xf32>,
    %c1_i32 = arith.constant 1 : i32
    %16 = tpu.dynamic_rotate %0 by %c1_i32 dim 1 : vector<8x512xf32>, i32 -> vector<8x512xf32>
    %c3 = arith.constant 3 : index
    %c0_9 = arith.constant 0 : index
    %17 = vector.load %arg2[%c3, %c0_9] : memref<9x512xf32, #tpu.memory_space<vmem>>, vector<1x512xf32>
    %18 = vector.broadcast %17 : vector<1x512xf32> to vector<8x512xf32>
    %19 = arith.mulf %16, %18 : vector<8x512xf32>
    %c24 = arith.constant 24 : index
    %c0_10 = arith.constant 0 : index
    %20 = vector.load %arg12[%c24, %c0_10] : memref<72x512xf32, #tpu.memory_space<vmem>>, vector<8x512xf32>
    tpu.vector_store %arg12[%c24, %c0_10], %19 {strides = array<i32>} : memref<72x512xf32, #tpu.memory_space<vmem>>, vector<8x512xf32>,
    %c32 = arith.constant 32 : index
    %c0_11 = arith.constant 0 : index
    %21 = vector.load %arg12[%c32, %c0_11] : memref<72x512xf32, #tpu.memory_space<vmem>>, vector<8x512xf32>
    tpu.vector_store %arg12[%c32, %c0_11], %0 {strides = array<i32>} : memref<72x512xf32, #tpu.memory_space<vmem>>, vector<8x512xf32>,
    %c511_i32 = arith.constant 511 : i32
    %22 = tpu.dynamic_rotate %0 by %c511_i32 dim 1 : vector<8x512xf32>, i32 -> vector<8x512xf32>
    %c5 = arith.constant 5 : index
    %c0_12 = arith.constant 0 : index
    %23 = vector.load %arg2[%c5, %c0_12] : memref<9x512xf32, #tpu.memory_space<vmem>>, vector<1x512xf32>
    %24 = vector.broadcast %23 : vector<1x512xf32> to vector<8x512xf32>
    %25 = arith.mulf %22, %24 : vector<8x512xf32>
    %c40 = arith.constant 40 : index
    %c0_13 = arith.constant 0 : index
    %26 = vector.load %arg12[%c40, %c0_13] : memref<72x512xf32, #tpu.memory_space<vmem>>, vector<8x512xf32>
    tpu.vector_store %arg12[%c40, %c0_13], %25 {strides = array<i32>} : memref<72x512xf32, #tpu.memory_space<vmem>>, vector<8x512xf32>,
    %c497_i32 = arith.constant 497 : i32
    %27 = tpu.dynamic_rotate %0 by %c497_i32 dim 1 : vector<8x512xf32>, i32 -> vector<8x512xf32>
    %c6 = arith.constant 6 : index
    %c0_14 = arith.constant 0 : index
    %28 = vector.load %arg2[%c6, %c0_14] : memref<9x512xf32, #tpu.memory_space<vmem>>, vector<1x512xf32>
    %29 = vector.broadcast %28 : vector<1x512xf32> to vector<8x512xf32>
    %30 = arith.mulf %27, %29 : vector<8x512xf32>
    %c48 = arith.constant 48 : index
    %c0_15 = arith.constant 0 : index
    %31 = vector.load %arg12[%c48, %c0_15] : memref<72x512xf32, #tpu.memory_space<vmem>>, vector<8x512xf32>
    tpu.vector_store %arg12[%c48, %c0_15], %30 {strides = array<i32>} : memref<72x512xf32, #tpu.memory_space<vmem>>, vector<8x512xf32>,
    %c496_i32 = arith.constant 496 : i32
    %32 = tpu.dynamic_rotate %0 by %c496_i32 dim 1 : vector<8x512xf32>, i32 -> vector<8x512xf32>
    %c7 = arith.constant 7 : index
    %c0_16 = arith.constant 0 : index
    %33 = vector.load %arg2[%c7, %c0_16] : memref<9x512xf32, #tpu.memory_space<vmem>>, vector<1x512xf32>
    %34 = vector.broadcast %33 : vector<1x512xf32> to vector<8x512xf32>
    %35 = arith.mulf %32, %34 : vector<8x512xf32>
    %c56 = arith.constant 56 : index
    %c0_17 = arith.constant 0 : index
    %36 = vector.load %arg12[%c56, %c0_17] : memref<72x512xf32, #tpu.memory_space<vmem>>, vector<8x512xf32>
    tpu.vector_store %arg12[%c56, %c0_17], %35 {strides = array<i32>} : memref<72x512xf32, #tpu.memory_space<vmem>>, vector<8x512xf32>,
    %c495_i32 = arith.constant 495 : i32
    %37 = tpu.dynamic_rotate %0 by %c495_i32 dim 1 : vector<8x512xf32>, i32 -> vector<8x512xf32>
    %c8_18 = arith.constant 8 : index
    %c0_19 = arith.constant 0 : index
    %38 = vector.load %arg2[%c8_18, %c0_19] : memref<9x512xf32, #tpu.memory_space<vmem>>, vector<1x512xf32>
    %39 = vector.broadcast %38 : vector<1x512xf32> to vector<8x512xf32>
    %40 = arith.mulf %37, %39 : vector<8x512xf32>
    %c64 = arith.constant 64 : index
    %c0_20 = arith.constant 0 : index
    %41 = vector.load %arg12[%c64, %c0_20] : memref<72x512xf32, #tpu.memory_space<vmem>>, vector<8x512xf32>
    tpu.vector_store %arg12[%c64, %c0_20], %40 {strides = array<i32>} : memref<72x512xf32, #tpu.memory_space<vmem>>, vector<8x512xf32>,
    %c0_21 = arith.constant 0 : index
    %c0_22 = arith.constant 0 : index
    %42 = vector.load %arg3[%c0_21, %c0_22] : memref<8x72xf32, #tpu.memory_space<vmem>>, vector<8x72xf32>
    %c0_23 = arith.constant 0 : index
    %c0_24 = arith.constant 0 : index
    %43 = vector.load %arg12[%c0_23, %c0_24] : memref<72x512xf32, #tpu.memory_space<vmem>>, vector<72x512xf32>
    %cst = arith.constant dense<0.000000e+00> : vector<8x512xf32>
    %44 = tpu.matmul %42, %43, %cst {dimension_numbers = #tpu.dot_dimension_numbers<[1], [0], [0], [1], [0, 0, 1, 1], [], []>} : vector<8x72xf32>, vector<72x512xf32>, vector<8x512xf32> -> vector<8x512xf32>
    %c0_25 = arith.constant 0 : index
    %c0_26 = arith.constant 0 : index
    %45 = vector.load %arg4[%c0_25, %c0_26] : memref<8x1xf32, #tpu.memory_space<vmem>>, vector<8x1xf32>
    %46 = vector.broadcast %45 : vector<8x1xf32> to vector<8x512xf32>
    %47 = arith.addf %44, %46 : vector<8x512xf32>
    %cst_27 = arith.constant dense<0.000000e+00> : vector<8xf32>
    %48 = vector.multi_reduction <add>, %47, %cst_27 [1] : vector<8x512xf32> to vector<8xf32>
    %49 = vector.shape_cast %48 : vector<8xf32> to vector<8x1xf32>
    %cst_28 = arith.constant 5.120000e+02 : f32
    %50 = vector.broadcast %cst_28 : f32 to vector<8x1xf32>
    %51 = arith.divf %49, %50 : vector<8x1xf32>
    %52 = vector.broadcast %51 : vector<8x1xf32> to vector<8x512xf32>
    %53 = arith.subf %47, %52 : vector<8x512xf32>
    %54 = arith.mulf %53, %53 : vector<8x512xf32>
    %cst_29 = arith.constant dense<0.000000e+00> : vector<8xf32>
    %55 = vector.multi_reduction <add>, %54, %cst_29 [1] : vector<8x512xf32> to vector<8xf32>
    %56 = vector.shape_cast %55 : vector<8xf32> to vector<8x1xf32>
    %cst_30 = arith.constant 5.120000e+02 : f32
    %57 = vector.broadcast %cst_30 : f32 to vector<8x1xf32>
    %58 = arith.divf %56, %57 : vector<8x1xf32>
    %c0_31 = arith.constant 0 : index
    %c0_32 = arith.constant 0 : index
    %59 = vector.load %arg5[%c0_31, %c0_32] : memref<8x1xf32, #tpu.memory_space<vmem>>, vector<8x1xf32>
    %cst_33 = arith.constant 9.99999974E-6 : f32
    %60 = vector.broadcast %cst_33 : f32 to vector<8x1xf32>
    %61 = arith.addf %58, %60 : vector<8x1xf32>
    %62 = math.rsqrt %61 : vector<8x1xf32>
    %63 = arith.mulf %59, %62 : vector<8x1xf32>
    %c0_34 = arith.constant 0 : index
    %c0_35 = arith.constant 0 : index
    %64 = vector.load %arg6[%c0_34, %c0_35] : memref<8x1xf32, #tpu.memory_space<vmem>>, vector<8x1xf32>
    %65 = arith.mulf %51, %63 : vector<8x1xf32>
    %66 = arith.subf %64, %65 : vector<8x1xf32>
    %67 = vector.broadcast %63 : vector<8x1xf32> to vector<8x512xf32>
    %68 = arith.mulf %47, %67 : vector<8x512xf32>
    %69 = vector.broadcast %66 : vector<8x1xf32> to vector<8x512xf32>
    %70 = arith.addf %68, %69 : vector<8x512xf32>
    %cst_36 = arith.constant 0.000000e+00 : f32
    %71 = vector.broadcast %cst_36 : f32 to vector<8x512xf32>
    %72 = arith.maximumf %70, %71 : vector<8x512xf32>
    %c17_i32_37 = arith.constant 17 : i32
    %73 = tpu.dynamic_rotate %72 by %c17_i32_37 dim 1 : vector<8x512xf32>, i32 -> vector<8x512xf32>
    %c0_38 = arith.constant 0 : index
    %c0_39 = arith.constant 0 : index
    %74 = vector.load %arg2[%c0_38, %c0_39] : memref<9x512xf32, #tpu.memory_space<vmem>>, vector<1x512xf32>
    %75 = vector.broadcast %74 : vector<1x512xf32> to vector<8x512xf32>
    %76 = arith.mulf %73, %75 : vector<8x512xf32>
    %c0_40 = arith.constant 0 : index
    %c0_41 = arith.constant 0 : index
    %77 = vector.load %arg12[%c0_40, %c0_41] : memref<72x512xf32, #tpu.memory_space<vmem>>, vector<8x512xf32>
    tpu.vector_store %arg12[%c0_40, %c0_41], %76 {strides = array<i32>} : memref<72x512xf32, #tpu.memory_space<vmem>>, vector<8x512xf32>,
    %c16_i32_42 = arith.constant 16 : i32
    %78 = tpu.dynamic_rotate %72 by %c16_i32_42 dim 1 : vector<8x512xf32>, i32 -> vector<8x512xf32>
    %c1_43 = arith.constant 1 : index
    %c0_44 = arith.constant 0 : index
    %79 = vector.load %arg2[%c1_43, %c0_44] : memref<9x512xf32, #tpu.memory_space<vmem>>, vector<1x512xf32>
    %80 = vector.broadcast %79 : vector<1x512xf32> to vector<8x512xf32>
    %81 = arith.mulf %78, %80 : vector<8x512xf32>
    %c8_45 = arith.constant 8 : index
    %c0_46 = arith.constant 0 : index
    %82 = vector.load %arg12[%c8_45, %c0_46] : memref<72x512xf32, #tpu.memory_space<vmem>>, vector<8x512xf32>
    tpu.vector_store %arg12[%c8_45, %c0_46], %81 {strides = array<i32>} : memref<72x512xf32, #tpu.memory_space<vmem>>, vector<8x512xf32>,
    %c15_i32_47 = arith.constant 15 : i32
    %83 = tpu.dynamic_rotate %72 by %c15_i32_47 dim 1 : vector<8x512xf32>, i32 -> vector<8x512xf32>
    %c2_48 = arith.constant 2 : index
    %c0_49 = arith.constant 0 : index
    %84 = vector.load %arg2[%c2_48, %c0_49] : memref<9x512xf32, #tpu.memory_space<vmem>>, vector<1x512xf32>
    %85 = vector.broadcast %84 : vector<1x512xf32> to vector<8x512xf32>
    %86 = arith.mulf %83, %85 : vector<8x512xf32>
    %c16_50 = arith.constant 16 : index
    %c0_51 = arith.constant 0 : index
    %87 = vector.load %arg12[%c16_50, %c0_51] : memref<72x512xf32, #tpu.memory_space<vmem>>, vector<8x512xf32>
    tpu.vector_store %arg12[%c16_50, %c0_51], %86 {strides = array<i32>} : memref<72x512xf32, #tpu.memory_space<vmem>>, vector<8x512xf32>,
    %c1_i32_52 = arith.constant 1 : i32
    %88 = tpu.dynamic_rotate %72 by %c1_i32_52 dim 1 : vector<8x512xf32>, i32 -> vector<8x512xf32>
    %c3_53 = arith.constant 3 : index
    %c0_54 = arith.constant 0 : index
    %89 = vector.load %arg2[%c3_53, %c0_54] : memref<9x512xf32, #tpu.memory_space<vmem>>, vector<1x512xf32>
    %90 = vector.broadcast %89 : vector<1x512xf32> to vector<8x512xf32>
    %91 = arith.mulf %88, %90 : vector<8x512xf32>
    %c24_55 = arith.constant 24 : index
    %c0_56 = arith.constant 0 : index
    %92 = vector.load %arg12[%c24_55, %c0_56] : memref<72x512xf32, #tpu.memory_space<vmem>>, vector<8x512xf32>
    tpu.vector_store %arg12[%c24_55, %c0_56], %91 {strides = array<i32>} : memref<72x512xf32, #tpu.memory_space<vmem>>, vector<8x512xf32>,
    %c32_57 = arith.constant 32 : index
    %c0_58 = arith.constant 0 : index
    %93 = vector.load %arg12[%c32_57, %c0_58] : memref<72x512xf32, #tpu.memory_space<vmem>>, vector<8x512xf32>
    tpu.vector_store %arg12[%c32_57, %c0_58], %72 {strides = array<i32>} : memref<72x512xf32, #tpu.memory_space<vmem>>, vector<8x512xf32>,
    %c511_i32_59 = arith.constant 511 : i32
    %94 = tpu.dynamic_rotate %72 by %c511_i32_59 dim 1 : vector<8x512xf32>, i32 -> vector<8x512xf32>
    %c5_60 = arith.constant 5 : index
    %c0_61 = arith.constant 0 : index
    %95 = vector.load %arg2[%c5_60, %c0_61] : memref<9x512xf32, #tpu.memory_space<vmem>>, vector<1x512xf32>
    %96 = vector.broadcast %95 : vector<1x512xf32> to vector<8x512xf32>
    %97 = arith.mulf %94, %96 : vector<8x512xf32>
    %c40_62 = arith.constant 40 : index
    %c0_63 = arith.constant 0 : index
    %98 = vector.load %arg12[%c40_62, %c0_63] : memref<72x512xf32, #tpu.memory_space<vmem>>, vector<8x512xf32>
    tpu.vector_store %arg12[%c40_62, %c0_63], %97 {strides = array<i32>} : memref<72x512xf32, #tpu.memory_space<vmem>>, vector<8x512xf32>,
    %c497_i32_64 = arith.constant 497 : i32
    %99 = tpu.dynamic_rotate %72 by %c497_i32_64 dim 1 : vector<8x512xf32>, i32 -> vector<8x512xf32>
    %c6_65 = arith.constant 6 : index
    %c0_66 = arith.constant 0 : index
    %100 = vector.load %arg2[%c6_65, %c0_66] : memref<9x512xf32, #tpu.memory_space<vmem>>, vector<1x512xf32>
    %101 = vector.broadcast %100 : vector<1x512xf32> to vector<8x512xf32>
    %102 = arith.mulf %99, %101 : vector<8x512xf32>
    %c48_67 = arith.constant 48 : index
    %c0_68 = arith.constant 0 : index
    %103 = vector.load %arg12[%c48_67, %c0_68] : memref<72x512xf32, #tpu.memory_space<vmem>>, vector<8x512xf32>
    tpu.vector_store %arg12[%c48_67, %c0_68], %102 {strides = array<i32>} : memref<72x512xf32, #tpu.memory_space<vmem>>, vector<8x512xf32>,
    %c496_i32_69 = arith.constant 496 : i32
    %104 = tpu.dynamic_rotate %72 by %c496_i32_69 dim 1 : vector<8x512xf32>, i32 -> vector<8x512xf32>
    %c7_70 = arith.constant 7 : index
    %c0_71 = arith.constant 0 : index
    %105 = vector.load %arg2[%c7_70, %c0_71] : memref<9x512xf32, #tpu.memory_space<vmem>>, vector<1x512xf32>
    %106 = vector.broadcast %105 : vector<1x512xf32> to vector<8x512xf32>
    %107 = arith.mulf %104, %106 : vector<8x512xf32>
    %c56_72 = arith.constant 56 : index
    %c0_73 = arith.constant 0 : index
    %108 = vector.load %arg12[%c56_72, %c0_73] : memref<72x512xf32, #tpu.memory_space<vmem>>, vector<8x512xf32>
    tpu.vector_store %arg12[%c56_72, %c0_73], %107 {strides = array<i32>} : memref<72x512xf32, #tpu.memory_space<vmem>>, vector<8x512xf32>,
    %c495_i32_74 = arith.constant 495 : i32
    %109 = tpu.dynamic_rotate %72 by %c495_i32_74 dim 1 : vector<8x512xf32>, i32 -> vector<8x512xf32>
    %c8_75 = arith.constant 8 : index
    %c0_76 = arith.constant 0 : index
    %110 = vector.load %arg2[%c8_75, %c0_76] : memref<9x512xf32, #tpu.memory_space<vmem>>, vector<1x512xf32>
    %111 = vector.broadcast %110 : vector<1x512xf32> to vector<8x512xf32>
    %112 = arith.mulf %109, %111 : vector<8x512xf32>
    %c64_77 = arith.constant 64 : index
    %c0_78 = arith.constant 0 : index
    %113 = vector.load %arg12[%c64_77, %c0_78] : memref<72x512xf32, #tpu.memory_space<vmem>>, vector<8x512xf32>
    tpu.vector_store %arg12[%c64_77, %c0_78], %112 {strides = array<i32>} : memref<72x512xf32, #tpu.memory_space<vmem>>, vector<8x512xf32>,
    %c0_79 = arith.constant 0 : index
    %c0_80 = arith.constant 0 : index
    %114 = vector.load %arg7[%c0_79, %c0_80] : memref<8x72xf32, #tpu.memory_space<vmem>>, vector<8x72xf32>
    %c0_81 = arith.constant 0 : index
    %c0_82 = arith.constant 0 : index
    %115 = vector.load %arg12[%c0_81, %c0_82] : memref<72x512xf32, #tpu.memory_space<vmem>>, vector<72x512xf32>
    %cst_83 = arith.constant dense<0.000000e+00> : vector<8x512xf32>
    %116 = tpu.matmul %114, %115, %cst_83 {dimension_numbers = #tpu.dot_dimension_numbers<[1], [0], [0], [1], [0, 0, 1, 1], [], []>} : vector<8x72xf32>, vector<72x512xf32>, vector<8x512xf32> -> vector<8x512xf32>
    %c0_84 = arith.constant 0 : index
    %c0_85 = arith.constant 0 : index
    %117 = vector.load %arg8[%c0_84, %c0_85] : memref<8x1xf32, #tpu.memory_space<vmem>>, vector<8x1xf32>
    %118 = vector.broadcast %117 : vector<8x1xf32> to vector<8x512xf32>
    %119 = arith.addf %116, %118 : vector<8x512xf32>
    %cst_86 = arith.constant dense<0.000000e+00> : vector<8xf32>
    %120 = vector.multi_reduction <add>, %119, %cst_86 [1] : vector<8x512xf32> to vector<8xf32>
    %121 = vector.shape_cast %120 : vector<8xf32> to vector<8x1xf32>
    %cst_87 = arith.constant 5.120000e+02 : f32
    %122 = vector.broadcast %cst_87 : f32 to vector<8x1xf32>
    %123 = arith.divf %121, %122 : vector<8x1xf32>
    %124 = vector.broadcast %123 : vector<8x1xf32> to vector<8x512xf32>
    %125 = arith.subf %119, %124 : vector<8x512xf32>
    %126 = arith.mulf %125, %125 : vector<8x512xf32>
    %cst_88 = arith.constant dense<0.000000e+00> : vector<8xf32>
    %127 = vector.multi_reduction <add>, %126, %cst_88 [1] : vector<8x512xf32> to vector<8xf32>
    %128 = vector.shape_cast %127 : vector<8xf32> to vector<8x1xf32>
    %cst_89 = arith.constant 5.120000e+02 : f32
    %129 = vector.broadcast %cst_89 : f32 to vector<8x1xf32>
    %130 = arith.divf %128, %129 : vector<8x1xf32>
    %c0_90 = arith.constant 0 : index
    %c0_91 = arith.constant 0 : index
    %131 = vector.load %arg9[%c0_90, %c0_91] : memref<8x1xf32, #tpu.memory_space<vmem>>, vector<8x1xf32>
    %cst_92 = arith.constant 9.99999974E-6 : f32
    %132 = vector.broadcast %cst_92 : f32 to vector<8x1xf32>
    %133 = arith.addf %130, %132 : vector<8x1xf32>
    %134 = math.rsqrt %133 : vector<8x1xf32>
    %135 = arith.mulf %131, %134 : vector<8x1xf32>
    %c0_93 = arith.constant 0 : index
    %c0_94 = arith.constant 0 : index
    %136 = vector.load %arg10[%c0_93, %c0_94] : memref<8x1xf32, #tpu.memory_space<vmem>>, vector<8x1xf32>
    %137 = arith.mulf %123, %135 : vector<8x1xf32>
    %138 = arith.subf %136, %137 : vector<8x1xf32>
    %139 = vector.broadcast %135 : vector<8x1xf32> to vector<8x512xf32>
    %140 = arith.mulf %119, %139 : vector<8x512xf32>
    %141 = vector.broadcast %138 : vector<8x1xf32> to vector<8x512xf32>
    %142 = arith.addf %140, %141 : vector<8x512xf32>
    %143 = arith.addf %0, %142 : vector<8x512xf32>
    %cst_95 = arith.constant 0.000000e+00 : f32
    %144 = vector.broadcast %cst_95 : f32 to vector<8x512xf32>
    %145 = arith.maximumf %143, %144 : vector<8x512xf32>
    %c0_96 = arith.constant 0 : index
    %c0_97 = arith.constant 0 : index
    %146 = vector.load %arg11[%c0_96, %c0_97] : memref<8x512xf32, #tpu.memory_space<vmem>>, vector<8x512xf32>
    tpu.vector_store %arg11[%c0_96, %c0_97], %145 {strides = array<i32>} : memref<8x512xf32, #tpu.memory_space<vmem>>, vector<8x512xf32>,
    return
  }
  func.func @transform_0(%arg0: i32) -> (i32, i32) {
    %c0_i32 = arith.constant 0 : i32
    %c0_i32_0 = arith.constant 0 : i32
    %c0_i32_1 = arith.constant 0 : i32
    return %c0_i32, %c0_i32_0 : i32, i32
  }
  func.func @transform_1(%arg0: i32) -> (i32, i32) {
    %c0_i32 = arith.constant 0 : i32
    %c0_i32_0 = arith.constant 0 : i32
    %c0_i32_1 = arith.constant 0 : i32
    return %c0_i32, %c0_i32_0 : i32, i32
  }
  func.func @transform_2(%arg0: i32) -> (i32, i32) {
    %c0_i32 = arith.constant 0 : i32
    %c0_i32_0 = arith.constant 0 : i32
    %c0_i32_1 = arith.constant 0 : i32
    return %c0_i32, %c0_i32_0 : i32, i32
  }
  func.func @transform_3(%arg0: i32) -> (i32, i32) {
    %c0_i32 = arith.constant 0 : i32
    %c0_i32_0 = arith.constant 0 : i32
    %c0_i32_1 = arith.constant 0 : i32
    return %c0_i32, %c0_i32_0 : i32, i32
  }
  func.func @transform_4(%arg0: i32) -> (i32, i32) {
    %c0_i32 = arith.constant 0 : i32
    %c0_i32_0 = arith.constant 0 : i32
    %c0_i32_1 = arith.constant 0 : i32
    return %c0_i32, %c0_i32_0 : i32, i32
  }
  func.func @transform_5(%arg0: i32) -> (i32, i32) {
    %c0_i32 = arith.constant 0 : i32
    %c0_i32_0 = arith.constant 0 : i32
    %c0_i32_1 = arith.constant 0 : i32
    return %c0_i32, %c0_i32_0 : i32, i32
  }
  func.func @transform_6(%arg0: i32) -> (i32, i32) {
    %c0_i32 = arith.constant 0 : i32
    %c0_i32_0 = arith.constant 0 : i32
    %c0_i32_1 = arith.constant 0 : i32
    return %c0_i32, %c0_i32_0 : i32, i32
  }
  func.func @transform_7(%arg0: i32) -> (i32, i32) {
    %c0_i32 = arith.constant 0 : i32
    %c0_i32_0 = arith.constant 0 : i32
    %c0_i32_1 = arith.constant 0 : i32
    return %c0_i32, %c0_i32_0 : i32, i32
  }
  func.func @transform_8(%arg0: i32) -> (i32, i32) {
    %c0_i32 = arith.constant 0 : i32
    %c0_i32_0 = arith.constant 0 : i32
    %c0_i32_1 = arith.constant 0 : i32
    return %c0_i32, %c0_i32_0 : i32, i32
  }
  func.func @transform_9(%arg0: i32) -> (i32, i32) {
    %c0_i32 = arith.constant 0 : i32
    %c0_i32_0 = arith.constant 0 : i32
    %c0_i32_1 = arith.constant 0 : i32
    return %c0_i32, %c0_i32_0 : i32, i32
  }
  func.func @transform_10(%arg0: i32) -> (i32, i32) {
    %c0_i32 = arith.constant 0 : i32
    %c0_i32_0 = arith.constant 0 : i32
    %c0_i32_1 = arith.constant 0 : i32
    return %c0_i32, %c0_i32_0 : i32, i32
  }
}

</mosaic_0001>

<bundles_post_ra>
// kernel: tpu_custom_call.1
= control target key start
LH: loop header
LB: loop body
LE: loop exit
PB: predicated region body
PF: predicated region fallthrough
CT: control target
= control target key end

     0   :  { %15 = vsyncpa [#allocation4], 0  ;;  %s1901_s0 = inlined_call_operand.vmem [shape: f32[8,512], index: 0, kind: input, shape index: {}]   ;;  %s1902_s1 = inlined_call_operand.hbm [shape: f32[9,512], index: 1, kind: input, shape index: {}]   ;;  %s1903_s2 = inlined_call_operand.vmem [shape: f32[8,72], index: 2, kind: input, shape index: {}]   ;;  %s1904_s3 = inlined_call_operand.vmem [shape: f32[8,1], index: 3, kind: input, shape index: {}]   ;;  %s1905_s4 = inlined_call_operand.vmem [shape: f32[8,1], index: 4, kind: input, shape index: {}]   ;;  %s1906_s5 = inlined_call_operand.vmem [shape: f32[8,1], index: 5, kind: input, shape index: {}]   ;;  %s1907_s6 = inlined_call_operand.vmem [shape: f32[8,72], index: 6, kind: input, shape index: {}]   ;;  %s1908_s7 = inlined_call_operand.vmem [shape: f32[8,1], index: 7, kind: input, shape index: {}]   ;;  %s1909_s8 = inlined_call_operand.vmem [shape: f32[8,1], index: 8, kind: input, shape index: {}]   ;;  %s1910_s9 = inlined_call_operand.vmem [shape: f32[8,1], index: 9, kind: input, shape index: {}]   ;;  %s1911_s10 = inlined_call_operand.hbm [shape: f32[8,512], index: 10, kind: output, shape index: {}]  }
   0x1   :  { %16 = vsyncpa [#allocation5], 0  ;;  %s1390_s13 = smov [#allocation3]   ;;  %s1342_s17 = scalar_lea.hbm %s1902_s1, 1024 }
   0x2   :  { %s24_s14 = sshll.u32 %s1390_s13, 4  ;;  %p1343_p0 = scmp.ne.s32.totalorder %s1902_s1, %s1342_s17  ;;  %s25_s14 = int_to_ptr.vmem [resolvable:$true] %s24_s14 }
   0x3   :  { %p1346_p1 = scmp.lt.u32.totalorder %s1342_s17, %s1902_s1 }
   0x5   :  { %p1348_p2 = pnand %p1346_p1, %p1343_p0 }
   0x7   :  { %1351 = shalt.err (!%p1348_p2)
}
   0x8   :  { %s1352_s22 = scalar_lea.vmem %s25_s14, 1024  ;;  %p1357_p4 = scmp.lt.s32.totalorder %s25_s14, %s25_s14 }
   0x9   :  { %p1353_p3 = scmp.ne.s32.totalorder %s25_s14, %s1352_s22  ;;  %p1358_p5 = scmp.lt.s32.totalorder %s1352_s22, %s1352_s22 }
   0xb   :  { %p1359_p6 = por %p1358_p5, %p1357_p4 }
   0xd   :  { %p1360_p7 = pnand %p1359_p6, %p1353_p3 }
   0xf   :  { %1363 = shalt.err (!%p1360_p7)
}
  0x10   :  { %s1391_s23 = smov 512   ;;  %s1392_s24 = smov 32  }
  0x11   :  { %30 = dma.hbm_to_vmem [thread:$0]  %s1902_s1, 1024, %s25_s14, [#allocation4], %s1391_s23, %s1391_s23, %s1392_s24  }
  0x12   :  { %1386 = dma.done.wait [#allocation4], 1024  }
  0x13   :  { %1387 = vsyncadd [#allocation4], 4294966272  ;;  %v1474_v0 = vld [vmem:[%s1901_s0] sm:$0xff]  ;;  %s1393_s29 = smov 16   ;;  %s1394_s30 = smov 17   ;;  %v1483_v1 = vld [vmem:[%s1901_s0 + $0x8] sm:$0xff]  ;;  %v62_v7 = vlaneseq }
  0x14   :  { %99 = vrot.lane.b32.xlu1 %v1474_v0, %s1393_s29  ;;  %54 = vrot.lane.b32.xlu0 %v1474_v0, %s1394_s30  ;;  %v1492_v2 = vld [vmem:[%s1901_s0 + $0x18] sm:$0xff]  ;;  %v1501_v3 = vld [vmem:[%s1901_s0 + $0x10] sm:$0xff]  ;;  %s1395_s16 = smov 15   ;;  %s1396_s17 = smov 1   ;;  %v1400_v4 = vmov 0.0   ;;  %v1401_v5 = vmov 0  }
  0x15   :  { %s1397_s18 = smov 127   ;;  %s1398_s19 = smov 113   ;;  %522 = vmatprep.mubr.f32.mxu0 %v1400_v4  ;;  %593 = vmatprep.mubr.f32.mxu1 %v1400_v4  ;;  %v448_v6 = vld [vmem:[%s1904_s3] sm:$0xff]  ;;  %v72_v8 = vshrl.u32 %v62_v7, 7  ;;  %v1560_v9 = vand.u32 127, %v62_v7  ;;  %vm454_vm8 = vcmask 588800  }
  0x16   :  { %s1399_s20 = smov 112   ;;  %1332 = vset.pattern.permute.xlu0 %v1401_v5  ;;  %1333 = vset.pattern.permute.xlu1 %v1401_v5  ;;  %s1402_s21 = smov 111   ;;  %v113_v11 = vld [vmem:[#allocation3 + $0x1] ss:$8 sm:$0xf] }
  0x17   :  { %v1562_v10 = vsub.s32 1, %v72_v8  ;;  %v69_v12 = vld [vmem:[#allocation3] ss:$8 sm:$0xf]  ;;  %v1564_v15 = vsub.s32 0, %v72_v8  ;;  %vm107_vm0 = vcmp.lt.s32.totalorder %v1560_v9, 16 }
  0x18   :  { %101 = vrot.lane.b32.xlu1 %v1483_v1, %s1393_s29  ;;  %56 = vrot.lane.b32.xlu0 %v1483_v1, %s1394_s30  ;;  %vm64_vm1 = vcmp.lt.s32.totalorder %v1560_v9, 17  ;;  %v1570_v20 = vsub.s32 2, %v72_v8  ;;  %v1572_v21 = vsub.s32 3, %v72_v8  ;;  %v157_v50 = vld [vmem:[#allocation3 + $0x2] ss:$8 sm:$0xf] }
  0x19   :  { %v78_v16 = vrot.slane %v69_v12, %v1562_v10  ;;  %v122_v17 = vrot.slane %v113_v11, %v1562_v10  ;;  %v118_v24 = vrot.slane %v113_v11, %v1564_v15  ;;  %v74_v25 = vrot.slane %v69_v12, %v1564_v15  ;;  %v201_v51 = vld [vmem:[#allocation3 + $0x3] ss:$8 sm:$0xf] }
  0x1a   :  { %v126_v33 = vrot.slane %v113_v11, %v1570_v20  ;;  %v130_v34 = vrot.slane %v113_v11, %v1572_v21  ;;  %v82_v37 = vrot.slane %v69_v12, %v1570_v20  ;;  %v86_v38 = vrot.slane %v69_v12, %v1572_v21 }
  0x1b   :  { %vm151_vm2 = vcmp.lt.s32.totalorder %v1560_v9, 15  ;;  %v166_v56 = vrot.slane %v157_v50, %v1562_v10  ;;  %vm195_vm3 = vcmp.lt.s32.totalorder %v1560_v9, 1  ;;  %v210_v57 = vrot.slane %v201_v51, %v1562_v10 }
  0x1c   :  { %105 = vrot.lane.b32.xlu1 %v1492_v2, %s1393_s29  ;;  %60 = vrot.lane.b32.xlu0 %v1492_v2, %s1394_s30  ;;  %v206_v5 = vrot.slane %v201_v51, %v1564_v15  ;;  %vm243_vm4 = vcmp.lt.s32.totalorder %v1560_v9, 127  ;;  %vm287_vm5 = vcmp.lt.s32.totalorder %v1560_v9, 113  ;;  %vm331_vm6 = vcmp.lt.s32.totalorder %v1560_v9, 112 }
  0x1d   :  { %vm375_vm7 = vcmp.lt.s32.totalorder %v1560_v9, 111 }
  0x20   :  { %103 = vrot.lane.b32.xlu1 %v1501_v3, %s1393_s29  ;;  %58 = vrot.lane.b32.xlu0 %v1501_v3, %s1394_s30 }
  0x24   :  { %145 = vrot.lane.b32.xlu1 %v1483_v1, %s1395_s16  ;;  %143 = vrot.lane.b32.xlu0 %v1474_v0, %s1395_s16 }
  0x28   :  { %189 = vrot.lane.b32.xlu1 %v1483_v1, %s1396_s17  ;;  %187 = vrot.lane.b32.xlu0 %v1474_v0, %s1396_s17 }
  0x2c   :  { %193 = vrot.lane.b32.xlu1 %v1492_v2, %s1396_s17  ;;  %149 = vrot.lane.b32.xlu0 %v1492_v2, %s1395_s16 }
  0x30   :  { %191 = vrot.lane.b32.xlu1 %v1501_v3, %s1396_s17  ;;  %147 = vrot.lane.b32.xlu0 %v1501_v3, %s1395_s16 }
  0x34   :  { %239 = vrot.lane.b32.xlu1 %v1501_v3, %s1397_s18  ;;  %237 = vrot.lane.b32.xlu0 %v1483_v1, %s1397_s18 }
  0x38   :  { %241 = vrot.lane.b32.xlu1 %v1492_v2, %s1397_s18  ;;  %235 = vrot.lane.b32.xlu0 %v1474_v0, %s1397_s18 }
  0x3c   :  { %283 = vrot.lane.b32.xlu1 %v1501_v3, %s1398_s19  ;;  %281 = vrot.lane.b32.xlu0 %v1483_v1, %s1398_s19 }
  0x40   :  { %327 = vrot.lane.b32.xlu1 %v1501_v3, %s1399_s20  ;;  %325 = vrot.lane.b32.xlu0 %v1483_v1, %s1399_s20 }
  0x44   :  { %323 = vrot.lane.b32.xlu1 %v1474_v0, %s1399_s20  ;;  %279 = vrot.lane.b32.xlu0 %v1474_v0, %s1398_s19 }
  0x48   :  { %329 = vrot.lane.b32.xlu1 %v1492_v2, %s1399_s20  ;;  %285 = vrot.lane.b32.xlu0 %v1492_v2, %s1398_s19 }
  0x4c   :  { %371 = vrot.lane.b32.xlu1 %v1501_v3, %s1402_s21  ;;  %369 = vrot.lane.b32.xlu0 %v1483_v1, %s1402_s21 }
  0x50   :  { %373 = vrot.lane.b32.xlu1 %v1492_v2, %s1402_s21  ;;  %367 = vrot.lane.b32.xlu0 %v1474_v0, %s1402_s21 }
  0x54   :  { %451 = vperm.xlu0 %1332, %v448_v6   ;;  %v162_v6 = vrot.slane %v157_v50, %v1564_v15 }
  0x86   :  { %v100_v13 = vpop.permute.xlu1 %99  ;;  %v55_v14 = vpop.permute.xlu0 %54 }
  0x8a   :  { %v102_v18 = vpop.permute.xlu1 %101  ;;  %v57_v19 = vpop.permute.xlu0 %56 }
  0x8b   :  { %v110_v22 = vsel %vm107_vm0, %v100_v13, %v102_v18  ;;  %v67_v23 = vsel %vm64_vm1, %v55_v14, %v57_v19 }
  0x8c   :  { %v92_v26 = vmul.f32 %v78_v16, %v67_v23  ;;  %v136_v27 = vmul.f32 %v122_v17, %v110_v22  ;;  %v218_v16 = vrot.slane %v201_v51, %v1572_v21  ;;  %v249_v17 = vld [vmem:[#allocation3 + $0x5] ss:$8 sm:$0xf]  ;;  %v170_v22 = vrot.slane %v157_v50, %v1570_v20 }
  0x8d   :  { %v174_v23 = vrot.slane %v157_v50, %v1572_v21 }
  0x8e   :  { %v106_v28 = vpop.permute.xlu1 %105  ;;  %v61_v29 = vpop.permute.xlu0 %60  ;;  %v1254_v30 = vpack.c.bf16 %v136_v27, %v92_v26  ;;  %v258_v27 = vrot.slane %v249_v17, %v1562_v10 }
  0x8f   :  { %v111_v31 = vsel %vm107_vm0, %v106_v28, %v100_v13  ;;  %v68_v32 = vsel %vm64_vm1, %v61_v29, %v55_v14  ;;  %v214_v14 = vrot.slane %v201_v51, %v1570_v20 }
  0x90   :  { %v135_v35 = vmul.f32 %v118_v24, %v111_v31  ;;  %v91_v36 = vmul.f32 %v74_v25, %v68_v32  ;;  %1255 = vmatprep.subr.bf16.mxu0 %v1254_v30 }
  0x92   :  { %v104_v39 = vpop.permute.xlu1 %103  ;;  %v59_v40 = vpop.permute.xlu0 %58  ;;  %v1256_v41 = vpack.c.bf16 %v135_v35, %v91_v36 }
  0x93   :  { %v108_v42 = vsel %vm107_vm0, %v104_v39, %v106_v28  ;;  %v109_v43 = vsel %vm107_vm0, %v102_v18, %v104_v39  ;;  %v65_v44 = vsel %vm64_vm1, %v59_v40, %v61_v29  ;;  %v66_v45 = vsel %vm64_vm1, %v57_v19, %v59_v40 }
  0x94   :  { %v137_v46 = vmul.f32 %v126_v33, %v109_v43  ;;  %v93_v47 = vmul.f32 %v82_v37, %v66_v45  ;;  %1257 = vmatpush1.bf16.msra.mxu0 %v1256_v41  ;;  %v94_v48 = vmul.f32 %v86_v38, %v65_v44  ;;  %v138_v49 = vmul.f32 %v130_v34, %v108_v42 }
  0x95   :  { %v262_v42 = vrot.slane %v249_v17, %v1570_v20  ;;  %v254_v43 = vrot.slane %v249_v17, %v1564_v15  ;;  %v266_v44 = vrot.slane %v249_v17, %v1572_v21 }
  0x96   :  { %v146_v52 = vpop.permute.xlu1 %145  ;;  %v144_v53 = vpop.permute.xlu0 %143  ;;  %v1270_v54 = vpack.c.bf16 %v138_v49, %v94_v48  ;;  %v1272_v55 = vpack.c.bf16 %v137_v46, %v93_v47 }
  0x97   :  { %v154_v58 = vsel %vm151_vm2, %v144_v53, %v146_v52 }
  0x98   :  { %1271 = vmatprep.subr.bf16.mxu1 %v1270_v54  ;;  %v180_v62 = vmul.f32 %v166_v56, %v154_v58  ;;  %v293_v54 = vld [vmem:[#allocation3 + $0x6] ss:$8 sm:$0xf] }
  0x99   :  { %1273 = vmatpush1.bf16.msra.mxu1 %v1272_v55  ;;  %v337_v55 = vld [vmem:[#allocation3 + $0x7] ss:$8 sm:$0xf] }
  0x9a   :  { %v190_v59 = vpop.permute.xlu1 %189  ;;  %v188_v60 = vpop.permute.xlu0 %187  ;;  %v354_v17 = vrot.slane %v337_v55, %v1572_v21 }
  0x9b   :  { %v198_v61 = vsel %vm195_vm3, %v188_v60, %v190_v59 }
  0x9c   :  { %v224_v63 = vmul.f32 %v210_v57, %v198_v61  ;;  %v346_v61 = vrot.slane %v337_v55, %v1562_v10 }
  0x9e   :  { %v194_v7 = vpop.permute.xlu1 %193  ;;  %v150_v8 = vpop.permute.xlu0 %149  ;;  %v1258_v11 = vpack.c.bf16 %v224_v63, %v180_v62 }
  0x9f   :  { %v199_v12 = vsel %vm195_vm3, %v194_v7, %v188_v60  ;;  %v155_v13 = vsel %vm151_vm2, %v150_v8, %v144_v53  ;;  %v302_v60 = vrot.slane %v293_v54, %v1562_v10 }
  0xa0   :  { %v223_v18 = vmul.f32 %v206_v5, %v199_v12  ;;  %v179_v19 = vmul.f32 %v162_v6, %v155_v13  ;;  %1259 = vmatprep.subr.bf16.mxu0 %v1258_v11 }
  0xa2   :  { %v192_v24 = vpop.permute.xlu1 %191  ;;  %v148_v25 = vpop.permute.xlu0 %147  ;;  %v1260_v26 = vpack.c.bf16 %v223_v18, %v179_v19  ;;  %v381_v18 = vld [vmem:[#allocation3 + $0x20] ss:$8 sm:$0xf] }
  0xa3   :  { %v196_v28 = vsel %vm195_vm3, %v192_v24, %v194_v7  ;;  %v197_v29 = vsel %vm195_vm3, %v190_v59, %v192_v24  ;;  %v152_v30 = vsel %vm151_vm2, %v148_v25, %v150_v8  ;;  %v153_v31 = vsel %vm151_vm2, %v146_v52, %v148_v25 }
  0xa4   :  { %v225_v32 = vmul.f32 %v214_v14, %v197_v29  ;;  %v226_v33 = vmul.f32 %v218_v16, %v196_v28  ;;  %v181_v34 = vmul.f32 %v170_v22, %v153_v31  ;;  %v182_v35 = vmul.f32 %v174_v23, %v152_v30  ;;  %1261 = vmatpush1.bf16.msra.mxu0 %v1260_v26 }
  0xa5   :  { %v298_v7 = vrot.slane %v293_v54, %v1564_v15  ;;  %v350_v16 = vrot.slane %v337_v55, %v1570_v20  ;;  %v306_v23 = vrot.slane %v293_v54, %v1570_v20  ;;  %v310_v24 = vrot.slane %v293_v54, %v1572_v21  ;;  %v411_v54 = vld [vmem:[%s1903_s2] sm:$0xff] }
  0xa6   :  { %v240_v36 = vpop.permute.xlu1 %239  ;;  %v238_v37 = vpop.permute.xlu0 %237  ;;  %v1274_v38 = vpack.c.bf16 %v226_v33, %v182_v35  ;;  %v1276_v39 = vpack.c.bf16 %v225_v32, %v181_v34  ;;  %v390_v28 = vrot.slane %v381_v18, %v1562_v10 }
  0xa7   :  { %v245_v40 = vsel %vm243_vm4, %v238_v37, %v240_v36 }
  0xa8   :  { %v272_v41 = vmul.f32 %v258_v27, %v245_v40  ;;  %1275 = vmatprep.subr.bf16.mxu1 %v1274_v38 }
  0xa9   :  { %1277 = vmatpush1.bf16.msra.mxu1 %v1276_v39 }
  0xaa   :  { %v242_v45 = vpop.permute.xlu1 %241  ;;  %v236_v46 = vpop.permute.xlu0 %235  ;;  %v1262_v47 = vpack.c.bf16 %v272_v41, %v1483_v1 }
  0xab   :  { %v244_v48 = vsel %vm243_vm4, %v240_v36, %v242_v45  ;;  %v246_v49 = vsel %vm243_vm4, %v236_v46, %v238_v37  ;;  %v247_v50 = vsel %vm243_vm4, %v242_v45, %v236_v46  ;;  %v398_v45 = vrot.slane %v381_v18, %v1572_v21 }
  0xac   :  { %v273_v51 = vmul.f32 %v262_v42, %v244_v48  ;;  %v271_v52 = vmul.f32 %v254_v43, %v246_v49  ;;  %v274_v53 = vmul.f32 %v266_v44, %v247_v50  ;;  %1263 = vmatprep.subr.bf16.mxu0 %v1262_v47  ;;  %v394_v43 = vrot.slane %v381_v18, %v1570_v20 }
  0xad   :  { %v386_v44 = vrot.slane %v381_v18, %v1564_v15 }
  0xae   :  { %v284_v56 = vpop.permute.xlu1 %283  ;;  %v282_v57 = vpop.permute.xlu0 %281  ;;  %v1264_v1 = vpack.c.bf16 %v271_v52, %v1474_v0  ;;  %v1278_v58 = vpack.c.bf16 %v274_v53, %v1492_v2  ;;  %v1280_v59 = vpack.c.bf16 %v273_v51, %v1501_v3  ;;  %v342_v3 = vrot.slane %v337_v55, %v1564_v15 }
  0xaf   :  { %v289_v62 = vsel %vm287_vm5, %v282_v57, %v284_v56 }
  0xb0   :  { %1265 = vmatpush1.bf16.msra.mxu0 %v1264_v1  ;;  %1279 = vmatprep.subr.bf16.mxu1 %v1278_v58  ;;  %v316_v2 = vmul.f32 %v302_v60, %v289_v62 }
  0xb1   :  { %1281 = vmatpush1.bf16.msra.mxu1 %v1280_v59 }
  0xb2   :  { %v328_v63 = vpop.permute.xlu1 %327  ;;  %v326_v5 = vpop.permute.xlu0 %325 }
  0xb3   :  { %v333_v0 = vsel %vm331_vm6, %v326_v5, %v328_v63 }
  0xb4   :  { %v360_v6 = vmul.f32 %v346_v61, %v333_v0 }
  0xb6   :  { %v324_v8 = vpop.permute.xlu1 %323  ;;  %v280_v11 = vpop.permute.xlu0 %279  ;;  %v1266_v12 = vpack.c.bf16 %v360_v6, %v316_v2 }
  0xb7   :  { %v334_v13 = vsel %vm331_vm6, %v324_v8, %v326_v5  ;;  %v290_v14 = vsel %vm287_vm5, %v280_v11, %v282_v57 }
  0xb8   :  { %v359_v19 = vmul.f32 %v342_v3, %v334_v13  ;;  %v315_v22 = vmul.f32 %v298_v7, %v290_v14  ;;  %1267 = vmatprep.subr.bf16.mxu0 %v1266_v12 }
  0xba   :  { %v330_v25 = vpop.permute.xlu1 %329  ;;  %v286_v26 = vpop.permute.xlu0 %285  ;;  %v1268_v27 = vpack.c.bf16 %v359_v19, %v315_v22 }
  0xbb   :  { %v332_v29 = vsel %vm331_vm6, %v328_v63, %v330_v25  ;;  %v335_v30 = vsel %vm331_vm6, %v330_v25, %v324_v8  ;;  %v288_v31 = vsel %vm287_vm5, %v284_v56, %v286_v26  ;;  %v291_v32 = vsel %vm287_vm5, %v286_v26, %v280_v11 }
  0xbc   :  { %v361_v33 = vmul.f32 %v350_v16, %v332_v29  ;;  %v362_v34 = vmul.f32 %v354_v17, %v335_v30  ;;  %v317_v35 = vmul.f32 %v306_v23, %v288_v31  ;;  %v318_v36 = vmul.f32 %v310_v24, %v291_v32  ;;  %1269 = vmatpush1.bf16.msra.mxu0 %v1268_v27  ;;  %v621_v24 = vld [vmem:[%s1905_s4] sm:$0xff] }
  0xbd   :  { %v625_v27 = vld [vmem:[%s1906_s5] sm:$0xff] }
  0xbe   :  { %v372_v37 = vpop.permute.xlu1 %371  ;;  %v370_v38 = vpop.permute.xlu0 %369  ;;  %v1282_v39 = vpack.c.bf16 %v362_v34, %v318_v36  ;;  %v1284_v40 = vpack.c.bf16 %v361_v33, %v317_v35 }
  0xbf   :  { %v377_v41 = vsel %vm375_vm7, %v370_v38, %v372_v37 }
  0xc0   :  { %v404_v42 = vmul.f32 %v390_v28, %v377_v41  ;;  %1283 = vmatprep.subr.bf16.mxu1 %v1282_v39 }
  0xc1   :  { %1285 = vmatpush1.bf16.msra.mxu1 %v1284_v40 }
  0xc2   :  { %v374_v46 = vpop.permute.xlu1 %373  ;;  %474 = vmatprep.subr.mxu0 %v404_v42  ;;  %v368_v47 = vpop.permute.xlu0 %367 }
  0xc3   :  { %v376_v48 = vsel %vm375_vm7, %v372_v37, %v374_v46  ;;  %v378_v49 = vsel %vm375_vm7, %v368_v47, %v370_v38  ;;  %v379_v50 = vsel %vm375_vm7, %v374_v46, %v368_v47  ;;  %v662_v47 = vld [vmem:[#allocation3] ss:$8 sm:$0xf] }
  0xc4   :  { %v405_v51 = vmul.f32 %v394_v43, %v376_v48  ;;  %v403_v52 = vmul.f32 %v386_v44, %v378_v49  ;;  %v406_v53 = vmul.f32 %v398_v45, %v379_v50  ;;  %v1027_v44 = vld [vmem:[%s1908_s7] sm:$0xff] }
  0xc5   :  { %v704_v48 = vld [vmem:[#allocation3 + $0x1] ss:$8 sm:$0xf] }
  0xc6   :  { %475 = vmatpush1.msra.mxu0 %v403_v52  ;;  %545 = vmatprep.subr.mxu1 %v406_v53  ;;  %v713_v52 = vrot.slane %v704_v48, %v1562_v10 }
  0xc7   :  { %1250 = vmatmul.mubr.msk.f32.vlgmr.msra.gmra.mrb[0].mxu0 %vm454_vm8, %v411_v54  ;;  %546 = vmatpush1.msra.mxu1 %v405_v51  ;;  %v671_v51 = vrot.slane %v662_v47, %v1562_v10 }
  0xc8   :  { %1251 = vmatmul.mubr.msk.f32.vlgmr.msra.gmra.mrb[0].mxu1 %vm454_vm8, %v411_v54  ;;  %1100 = vmatprep.mubr.f32.mxu0 %v1400_v4 }
  0xc9   :  { %1171 = vmatprep.mubr.f32.mxu1 %v1400_v4 }
  0xd3   :  { %v452_v55 = vpop.permute.xlu0 %451 }
 0x19a   :  { %v524_v56 = vpop.f32.mrb[0].mxu0 }
 0x19b   :  { %v525_v57 = vadd.f32 %v524_v56, %v452_v55  ;;  %v526_v1 = vpop.f32.mrb[1].mxu0  ;;  %v595_v58 = vpop.f32.mrb[0].mxu1 }
 0x19c   :  { %v527_v59 = vadd.f32 %v526_v1, %v452_v55  ;;  %v597_v60 = vpop.f32.mrb[1].mxu1  ;;  %v596_v62 = vadd.f32 %v595_v58, %v452_v55 }
 0x19d   :  { %v598_v63 = vadd.f32 %v597_v60, %v452_v55 }
 0x19e   :  { %v600_v61 = vadd.f32 %v527_v59, %v525_v57 }
 0x1a0   :  { %v601_v5 = vadd.f32 %v600_v61, %v596_v62 }
 0x1a2   :  { %v602_v0 = vadd.f32 %v601_v5, %v598_v63  ;;  %v675_v5 = vrot.slane %v662_v47, %v1570_v20 }
 0x1a4   :  { %603 = vadd.xlane.f32.xlu1 %v602_v0  ;;  %v679_v0 = vrot.slane %v662_v47, %v1572_v21 }
 0x231   :  { %v604_v2 = vpop.xlane.xlu1 %603 }
 0x232   :  { %v606_v6 = vmul.f32 0.001953125, %v604_v2 }
 0x234   :  { %v607_v3 = vsub.f32 %v525_v57, %v606_v6  ;;  %v608_v7 = vsub.f32 %v527_v59, %v606_v6  ;;  %v609_v8 = vsub.f32 %v596_v62, %v606_v6  ;;  %v610_v11 = vsub.f32 %v598_v63, %v606_v6 }
 0x236   :  { %v611_v4 = vmul.f32 %v607_v3, %v607_v3  ;;  %v612_v12 = vmul.f32 %v608_v7, %v608_v7  ;;  %v613_v13 = vmul.f32 %v609_v8, %v609_v8  ;;  %v614_v16 = vmul.f32 %v610_v11, %v610_v11 }
 0x237   :  { %v717_v7 = vrot.slane %v704_v48, %v1570_v20  ;;  %v721_v8 = vrot.slane %v704_v48, %v1572_v21 }
 0x238   :  { %v615_v14 = vadd.f32 %v612_v12, %v611_v4 }
 0x23a   :  { %v616_v17 = vadd.f32 %v615_v14, %v613_v13 }
 0x23c   :  { %v617_v18 = vadd.f32 %v616_v17, %v614_v16 }
 0x23e   :  { %618 = vadd.xlane.f32.xlu0 %v617_v18 }
 0x2cb   :  { %v619_v19 = vpop.xlane.xlu0 %618 }
 0x2cc   :  { %v620_v22 = vmul.f32 0.001953125, %v619_v19 }
 0x2ce   :  { %v622_v23 = vadd.f32 1e-05, %v620_v22 }
 0x2d0   :  { %1334 = vrsqrt.f32 %v622_v23 }
 0x2da   :  { %v1335_v25 = vpop.eup %1334 }
 0x2db   :  { %v624_v26 = vmul.f32 %v1335_v25, %v621_v24  ;;  %v746_v24 = vld [vmem:[#allocation3 + $0x2] ss:$8 sm:$0xf]  ;;  %v788_v25 = vld [vmem:[#allocation3 + $0x3] ss:$8 sm:$0xf] }
 0x2dd   :  { %630 = vperm.xlu1 %1333, %v624_v26   ;;  %v626_v28 = vmul.f32 %v624_v26, %v606_v6 }
 0x2df   :  { %v627_v29 = vsub.f32 %v625_v27, %v626_v28 }
 0x2e1   :  { %639 = vperm.xlu0 %1332, %v627_v29  }
 0x35c   :  { %v631_v30 = vpop.permute.xlu1 %630 }
 0x35d   :  { %v633_v31 = vmul.f32 %v631_v30, %v525_v57  ;;  %v634_v33 = vmul.f32 %v631_v30, %v527_v59  ;;  %v636_v34 = vmul.f32 %v631_v30, %v598_v63  ;;  %v635_v39 = vmul.f32 %v631_v30, %v596_v62 }
 0x35e   :  { %v667_v57 = vrot.slane %v662_v47, %v1564_v15  ;;  %v709_v59 = vrot.slane %v704_v48, %v1564_v15  ;;  %v755_v30 = vrot.slane %v746_v24, %v1562_v10  ;;  %v759_v48 = vrot.slane %v746_v24, %v1570_v20 }
 0x360   :  { %v640_v32 = vpop.permute.xlu0 %639 }
 0x361   :  { %v642_v35 = vadd.f32 %v640_v32, %v633_v31  ;;  %v643_v36 = vadd.f32 %v640_v32, %v634_v33  ;;  %v645_v37 = vadd.f32 %v640_v32, %v636_v34  ;;  %v644_v40 = vadd.f32 %v640_v32, %v635_v39 }
 0x362   :  { %v797_v31 = vrot.slane %v788_v25, %v1562_v10 }
 0x363   :  { %v1691_v38 = vmax.f32 %v642_v35, 0.0  ;;  %v1697_v41 = vmax.f32 %v643_v36, 0.0  ;;  %v1699_v42 = vmax.f32 %v645_v37, 0.0  ;;  %v1705_v43 = vmax.f32 %v644_v40, 0.0 }
 0x364   :  { %v751_v36 = vrot.slane %v746_v24, %v1564_v15  ;;  %v793_v40 = vrot.slane %v788_v25, %v1564_v15 }
 0x365   :  { %692 = vrot.lane.b32.xlu0 %v1691_v38, %s1393_s29  ;;  %650 = vrot.lane.b32.xlu1 %v1691_v38, %s1394_s30 }
 0x369   :  { %656 = vrot.lane.b32.xlu0 %v1699_v42, %s1394_s30  ;;  %652 = vrot.lane.b32.xlu1 %v1697_v41, %s1394_s30 }
 0x36d   :  { %654 = vrot.lane.b32.xlu0 %v1705_v43, %s1394_s30  ;;  %694 = vrot.lane.b32.xlu1 %v1697_v41, %s1393_s29 }
 0x371   :  { %734 = vrot.lane.b32.xlu0 %v1691_v38, %s1395_s16  ;;  %698 = vrot.lane.b32.xlu1 %v1699_v42, %s1393_s29 }
 0x375   :  { %776 = vrot.lane.b32.xlu0 %v1691_v38, %s1396_s17  ;;  %696 = vrot.lane.b32.xlu1 %v1705_v43, %s1393_s29 }
 0x379   :  { %740 = vrot.lane.b32.xlu0 %v1699_v42, %s1395_s16  ;;  %736 = vrot.lane.b32.xlu1 %v1697_v41, %s1395_s16 }
 0x37d   :  { %738 = vrot.lane.b32.xlu0 %v1705_v43, %s1395_s16  ;;  %778 = vrot.lane.b32.xlu1 %v1697_v41, %s1396_s17 }
 0x381   :  { %824 = vrot.lane.b32.xlu0 %v1697_v41, %s1397_s18  ;;  %782 = vrot.lane.b32.xlu1 %v1699_v42, %s1396_s17 }
 0x385   :  { %822 = vrot.lane.b32.xlu0 %v1691_v38, %s1397_s18  ;;  %780 = vrot.lane.b32.xlu1 %v1705_v43, %s1396_s17 }
 0x389   :  { %866 = vrot.lane.b32.xlu0 %v1697_v41, %s1398_s19  ;;  %826 = vrot.lane.b32.xlu1 %v1705_v43, %s1397_s18 }
 0x38d   :  { %908 = vrot.lane.b32.xlu0 %v1697_v41, %s1399_s20  ;;  %828 = vrot.lane.b32.xlu1 %v1699_v42, %s1397_s18 }
 0x391   :  { %864 = vrot.lane.b32.xlu0 %v1691_v38, %s1398_s19  ;;  %868 = vrot.lane.b32.xlu1 %v1705_v43, %s1398_s19 }
 0x395   :  { %870 = vrot.lane.b32.xlu0 %v1699_v42, %s1398_s19  ;;  %910 = vrot.lane.b32.xlu1 %v1705_v43, %s1399_s20 }
 0x399   :  { %950 = vrot.lane.b32.xlu0 %v1697_v41, %s1402_s21  ;;  %906 = vrot.lane.b32.xlu1 %v1691_v38, %s1399_s20 }
 0x39d   :  { %948 = vrot.lane.b32.xlu0 %v1691_v38, %s1402_s21  ;;  %912 = vrot.lane.b32.xlu1 %v1699_v42, %s1399_s20 }
 0x3a1   :  { %1030 = vperm.xlu0 %1332, %v1027_v44   ;;  %952 = vrot.lane.b32.xlu1 %v1705_v43, %s1402_s21 }
 0x3a5   :  { %954 = vrot.lane.b32.xlu1 %v1699_v42, %s1402_s21 }
 0x3d7   :  { %v693_v45 = vpop.permute.xlu0 %692  ;;  %v651_v46 = vpop.permute.xlu1 %650 }
 0x3db   :  { %v657_v49 = vpop.permute.xlu0 %656  ;;  %v653_v50 = vpop.permute.xlu1 %652 }
 0x3dc   :  { %v660_v53 = vsel %vm64_vm1, %v651_v46, %v653_v50  ;;  %v661_v60 = vsel %vm64_vm1, %v657_v49, %v651_v46 }
 0x3dd   :  { %v685_v1 = vmul.f32 %v671_v51, %v660_v53  ;;  %v684_v6 = vmul.f32 %v667_v57, %v661_v60  ;;  %v834_v51 = vld [vmem:[#allocation3 + $0x5] ss:$8 sm:$0xf] }
 0x3df   :  { %v655_v54 = vpop.permute.xlu0 %654  ;;  %v695_v55 = vpop.permute.xlu1 %694 }
 0x3e0   :  { %v702_v56 = vsel %vm107_vm0, %v693_v45, %v695_v55  ;;  %v658_v11 = vsel %vm64_vm1, %v655_v54, %v657_v49  ;;  %v659_v4 = vsel %vm64_vm1, %v653_v50, %v655_v54  ;;  %v763_v49 = vrot.slane %v746_v24, %v1572_v21 }
 0x3e1   :  { %v727_v58 = vmul.f32 %v713_v52, %v702_v56  ;;  %v686_v18 = vmul.f32 %v675_v5, %v659_v4  ;;  %v687_v19 = vmul.f32 %v679_v0, %v658_v11  ;;  %v801_v52 = vrot.slane %v788_v25, %v1570_v20 }
 0x3e2   :  { %v805_v56 = vrot.slane %v788_v25, %v1572_v21  ;;  %v843_v5 = vrot.slane %v834_v51, %v1562_v10 }
 0x3e3   :  { %v735_v61 = vpop.permute.xlu0 %734  ;;  %v699_v62 = vpop.permute.xlu1 %698  ;;  %v1286_v63 = vpack.c.bf16 %v727_v58, %v685_v1  ;;  %v839_v58 = vrot.slane %v834_v51, %v1564_v15 }
 0x3e4   :  { %v703_v2 = vsel %vm107_vm0, %v699_v62, %v693_v45 }
 0x3e5   :  { %v726_v3 = vmul.f32 %v709_v59, %v703_v2  ;;  %1287 = vmatprep.subr.bf16.mxu0 %v1286_v63 }
 0x3e7   :  { %v1288_v12 = vpack.c.bf16 %v726_v3, %v684_v6  ;;  %v777_v13 = vpop.permute.xlu0 %776  ;;  %v697_v14 = vpop.permute.xlu1 %696 }
 0x3e8   :  { %v700_v16 = vsel %vm107_vm0, %v697_v14, %v699_v62  ;;  %v701_v17 = vsel %vm107_vm0, %v695_v55, %v697_v14 }
 0x3e9   :  { %v728_v22 = vmul.f32 %v717_v7, %v701_v17  ;;  %v729_v23 = vmul.f32 %v721_v8, %v700_v16  ;;  %1289 = vmatpush1.bf16.msra.mxu0 %v1288_v12  ;;  %v847_v16 = vrot.slane %v834_v51, %v1570_v20  ;;  %v851_v17 = vrot.slane %v834_v51, %v1572_v21 }
 0x3eb   :  { %v1304_v26 = vpack.c.bf16 %v728_v22, %v686_v18  ;;  %v741_v27 = vpop.permute.xlu0 %740  ;;  %v737_v28 = vpop.permute.xlu1 %736  ;;  %v1302_v29 = vpack.c.bf16 %v729_v23, %v687_v19 }
 0x3ec   :  { %v744_v32 = vsel %vm151_vm2, %v735_v61, %v737_v28  ;;  %v745_v44 = vsel %vm151_vm2, %v741_v27, %v735_v61 }
 0x3ed   :  { %1303 = vmatprep.subr.bf16.mxu1 %v1302_v29  ;;  %v769_v37 = vmul.f32 %v755_v30, %v744_v32  ;;  %v768_v53 = vmul.f32 %v751_v36, %v745_v44  ;;  %v918_v29 = vld [vmem:[#allocation3 + $0x7] ss:$8 sm:$0xf] }
 0x3ee   :  { %1305 = vmatpush1.bf16.msra.mxu1 %v1304_v26 }
 0x3ef   :  { %v739_v33 = vpop.permute.xlu0 %738  ;;  %v779_v34 = vpop.permute.xlu1 %778 }
 0x3f0   :  { %v786_v35 = vsel %vm195_vm3, %v777_v13, %v779_v34  ;;  %v743_v54 = vsel %vm151_vm2, %v737_v28, %v739_v33  ;;  %v742_v57 = vsel %vm151_vm2, %v739_v33, %v741_v27  ;;  %v876_v28 = vld [vmem:[#allocation3 + $0x6] ss:$8 sm:$0xf]  ;;  %v927_v33 = vrot.slane %v918_v29, %v1562_v10 }
 0x3f1   :  { %v811_v39 = vmul.f32 %v797_v31, %v786_v35  ;;  %v770_v61 = vmul.f32 %v759_v48, %v743_v54  ;;  %v771_v0 = vmul.f32 %v763_v49, %v742_v57  ;;  %v889_v48 = vrot.slane %v876_v28, %v1570_v20 }
 0x3f2   :  { %v893_v49 = vrot.slane %v876_v28, %v1572_v21  ;;  %v935_v54 = vrot.slane %v918_v29, %v1572_v21 }
 0x3f3   :  { %v825_v45 = vpop.permute.xlu0 %824  ;;  %v783_v46 = vpop.permute.xlu1 %782  ;;  %v1290_v47 = vpack.c.bf16 %v811_v39, %v769_v37 }
 0x3f4   :  { %v787_v50 = vsel %vm195_vm3, %v783_v46, %v777_v13 }
 0x3f5   :  { %v810_v55 = vmul.f32 %v793_v40, %v787_v50  ;;  %1291 = vmatprep.subr.bf16.mxu0 %v1290_v47 }
 0x3f7   :  { %v1292_v1 = vpack.c.bf16 %v810_v55, %v768_v53  ;;  %v823_v59 = vpop.permute.xlu0 %822  ;;  %v781_v60 = vpop.permute.xlu1 %780  ;;  %v931_v53 = vrot.slane %v918_v29, %v1570_v20 }
 0x3f8   :  { %v784_v62 = vsel %vm195_vm3, %v781_v60, %v783_v46  ;;  %v785_v63 = vsel %vm195_vm3, %v779_v34, %v781_v60  ;;  %v832_v2 = vsel %vm243_vm4, %v823_v59, %v825_v45 }
 0x3f9   :  { %v812_v6 = vmul.f32 %v801_v52, %v785_v63  ;;  %v813_v3 = vmul.f32 %v805_v56, %v784_v62  ;;  %1293 = vmatpush1.bf16.msra.mxu0 %v1292_v1  ;;  %v856_v12 = vmul.f32 %v839_v58, %v832_v2  ;;  %v960_v1 = vld [vmem:[#allocation3 + $0x20] ss:$8 sm:$0xf] }
 0x3fa   :  { %v969_v62 = vrot.slane %v960_v1, %v1562_v10 }
 0x3fb   :  { %v1308_v7 = vpack.c.bf16 %v812_v6, %v770_v61  ;;  %v867_v8 = vpop.permute.xlu0 %866  ;;  %v827_v11 = vpop.permute.xlu1 %826  ;;  %v1306_v4 = vpack.c.bf16 %v813_v3, %v771_v0  ;;  %v1296_v23 = vpack.c.bf16 %v856_v12, %v1691_v38  ;;  %v885_v38 = vrot.slane %v876_v28, %v1562_v10 }
 0x3fc   :  { %v831_v13 = vsel %vm243_vm4, %v825_v45, %v827_v11  ;;  %v965_v6 = vrot.slane %v960_v1, %v1564_v15  ;;  %v973_v10 = vrot.slane %v960_v1, %v1570_v20 }
 0x3fd   :  { %v857_v14 = vmul.f32 %v843_v5, %v831_v13  ;;  %1307 = vmatprep.subr.bf16.mxu1 %v1306_v4  ;;  %v977_v13 = vrot.slane %v960_v1, %v1572_v21 }
 0x3fe   :  { %1309 = vmatpush1.bf16.msra.mxu1 %v1308_v7 }
 0x3ff   :  { %v909_v18 = vpop.permute.xlu0 %908  ;;  %v829_v19 = vpop.permute.xlu1 %828  ;;  %v1294_v22 = vpack.c.bf16 %v857_v14, %v1697_v41 }
 0x400   :  { %v830_v24 = vsel %vm243_vm4, %v827_v11, %v829_v19  ;;  %v833_v25 = vsel %vm243_vm4, %v829_v19, %v823_v59 }
 0x401   :  { %v858_v26 = vmul.f32 %v847_v16, %v830_v24  ;;  %v859_v27 = vmul.f32 %v851_v17, %v833_v25  ;;  %1295 = vmatprep.subr.bf16.mxu0 %v1294_v22 }
 0x402   :  { %1297 = vmatpush1.bf16.msra.mxu0 %v1296_v23 }
 0x403   :  { %v1312_v30 = vpack.c.bf16 %v858_v26, %v1705_v43  ;;  %v865_v31 = vpop.permute.xlu0 %864  ;;  %v869_v32 = vpop.permute.xlu1 %868  ;;  %v1310_v41 = vpack.c.bf16 %v859_v27, %v1699_v42  ;;  %v881_v43 = vrot.slane %v876_v28, %v1564_v15  ;;  %v923_v42 = vrot.slane %v918_v29, %v1564_v15  ;;  %v990_v15 = vld [vmem:[%s1907_s6] sm:$0xff] }
 0x404   :  { %v873_v34 = vsel %vm287_vm5, %v867_v8, %v869_v32  ;;  %v874_v44 = vsel %vm287_vm5, %v865_v31, %v867_v8 }
 0x405   :  { %1311 = vmatprep.subr.bf16.mxu1 %v1310_v41  ;;  %v899_v39 = vmul.f32 %v885_v38, %v873_v34  ;;  %v898_v51 = vmul.f32 %v881_v43, %v874_v44 }
 0x406   :  { %1313 = vmatpush1.bf16.msra.mxu1 %v1312_v30 }
 0x407   :  { %v871_v35 = vpop.permute.xlu0 %870  ;;  %v911_v36 = vpop.permute.xlu1 %910 }
 0x408   :  { %v915_v37 = vsel %vm331_vm6, %v909_v18, %v911_v36  ;;  %v872_v55 = vsel %vm287_vm5, %v869_v32, %v871_v35  ;;  %v875_v56 = vsel %vm287_vm5, %v871_v35, %v865_v31 }
 0x409   :  { %v941_v40 = vmul.f32 %v927_v33, %v915_v37  ;;  %v900_v63 = vmul.f32 %v889_v48, %v872_v55  ;;  %v901_v5 = vmul.f32 %v893_v49, %v875_v56  ;;  %v1198_v48 = vld [vmem:[%s1909_s8] sm:$0xff]  ;;  %s1403_s8 = smov [#allocation6]  }
 0x40a   :  { %s1241_s12 = sshll.u32 %s1403_s8, 4  ;;  %s1242_s12 = int_to_ptr.vmem [resolvable:$true] %s1241_s12 }
 0x40b   :  { %v951_v45 = vpop.permute.xlu0 %950  ;;  %v907_v46 = vpop.permute.xlu1 %906  ;;  %v1298_v47 = vpack.c.bf16 %v941_v40, %v899_v39  ;;  %s1364_s19 = scalar_lea.vmem %s1242_s12, 512  ;;  %p1369_p9 = scmp.lt.s32.totalorder %s1242_s12, %s1242_s12 }
 0x40c   :  { %v916_v50 = vsel %vm331_vm6, %v907_v46, %v909_v18  ;;  %p1365_p8 = scmp.ne.s32.totalorder %s1242_s12, %s1364_s19  ;;  %p1370_p10 = scmp.lt.s32.totalorder %s1364_s19, %s1364_s19 }
 0x40d   :  { %v940_v52 = vmul.f32 %v923_v42, %v916_v50  ;;  %1299 = vmatprep.subr.bf16.mxu0 %v1298_v47 }
 0x40e   :  { %p1371_p11 = por %p1370_p10, %p1369_p9 }
 0x40f   :  { %v1300_v57 = vpack.c.bf16 %v940_v52, %v898_v51  ;;  %v913_v58 = vpop.permute.xlu1 %912  ;;  %v949_v59 = vpop.permute.xlu0 %948  ;;  %v1202_v51 = vld [vmem:[%s1910_s9] sm:$0xff] }
 0x410   :  { %v914_v60 = vsel %vm331_vm6, %v911_v36, %v913_v58  ;;  %v917_v61 = vsel %vm331_vm6, %v913_v58, %v907_v46  ;;  %v958_v3 = vsel %vm375_vm7, %v949_v59, %v951_v45  ;;  %p1372_p12 = pnand %p1371_p11, %p1365_p8 }
 0x411   :  { %v942_v0 = vmul.f32 %v931_v53, %v914_v60  ;;  %v943_v2 = vmul.f32 %v935_v54, %v917_v61  ;;  %1301 = vmatpush1.bf16.msra.mxu0 %v1300_v57  ;;  %v982_v14 = vmul.f32 %v965_v6, %v958_v3  ;;  %v1340_v6 = vld [vmem:[%s1901_s0 + $0x10] sm:$0xff] }
 0x413   :  { %v1316_v7 = vpack.c.bf16 %v942_v0, %v900_v63  ;;  %v953_v8 = vpop.permute.xlu1 %952  ;;  %v1314_v11 = vpack.c.bf16 %v943_v2, %v901_v5  ;;  %v1338_v63 = vld [vmem:[%s1901_s0] sm:$0xff]  ;;  %v1339_v0 = vld [vmem:[%s1901_s0 + $0x8] sm:$0xff] }
 0x414   :  { %v957_v4 = vsel %vm375_vm7, %v951_v45, %v953_v8 }
 0x415   :  { %v983_v12 = vmul.f32 %v969_v62, %v957_v4  ;;  %1315 = vmatprep.subr.bf16.mxu1 %v1314_v11 }
 0x416   :  { %1317 = vmatpush1.bf16.msra.mxu1 %v1316_v7  ;;  %v1341_v7 = vld [vmem:[%s1901_s0 + $0x18] sm:$0xff] }
 0x417   :  { %1052 = vmatprep.subr.mxu0 %v983_v12  ;;  %v955_v16 = vpop.permute.xlu1 %954 }
 0x418   :  { %v956_v17 = vsel %vm375_vm7, %v953_v8, %v955_v16  ;;  %v959_v18 = vsel %vm375_vm7, %v955_v16, %v949_v59  ;;  %1053 = vmatpush1.msra.mxu0 %v982_v14 }
 0x419   :  { %v984_v19 = vmul.f32 %v973_v10, %v956_v17  ;;  %v985_v22 = vmul.f32 %v977_v13, %v959_v18  ;;  %1252 = vmatmul.mubr.msk.f32.vlgmr.msra.gmra.mrb[2].mxu0 %vm454_vm8, %v990_v15 }
 0x41b   :  { %1123 = vmatprep.subr.mxu1 %v985_v22 }
 0x41c   :  { %1124 = vmatpush1.msra.mxu1 %v984_v19 }
 0x41d   :  { %1253 = vmatmul.mubr.msk.f32.vlgmr.msra.gmra.mrb[2].mxu1 %vm454_vm8, %v990_v15 }
 0x420   :  { %v1031_v20 = vpop.permute.xlu0 %1030 }
 0x4ec   :  { %v1102_v21 = vpop.f32.mrb[2].mxu0 }
 0x4ed   :  { %v1103_v23 = vadd.f32 %v1102_v21, %v1031_v20  ;;  %v1104_v24 = vpop.f32.mrb[3].mxu0 }
 0x4ee   :  { %v1105_v25 = vadd.f32 %v1104_v24, %v1031_v20 }
 0x4f0   :  { %v1178_v26 = vadd.f32 %v1105_v25, %v1103_v23  ;;  %v1173_v27 = vpop.f32.mrb[2].mxu1 }
 0x4f1   :  { %v1174_v28 = vadd.f32 %v1173_v27, %v1031_v20  ;;  %v1175_v29 = vpop.f32.mrb[3].mxu1 }
 0x4f2   :  { %v1176_v9 = vadd.f32 %v1175_v29, %v1031_v20 }
 0x4f3   :  { %v1179_v30 = vadd.f32 %v1178_v26, %v1174_v28 }
 0x4f5   :  { %v1180_v31 = vadd.f32 %v1179_v30, %v1176_v9 }
 0x4f7   :  { %1181 = vadd.xlane.f32.xlu1 %v1180_v31 }
 0x584   :  { %v1182_v32 = vpop.xlane.xlu1 %1181 }
 0x585   :  { %v1183_v41 = vmul.f32 0.001953125, %v1182_v32 }
 0x587   :  { %v1184_v38 = vsub.f32 %v1103_v23, %v1183_v41  ;;  %v1185_v33 = vsub.f32 %v1105_v25, %v1183_v41  ;;  %v1186_v34 = vsub.f32 %v1174_v28, %v1183_v41  ;;  %v1187_v35 = vsub.f32 %v1176_v9, %v1183_v41 }
 0x589   :  { %v1188_v36 = vmul.f32 %v1184_v38, %v1184_v38  ;;  %v1189_v37 = vmul.f32 %v1185_v33, %v1185_v33  ;;  %v1190_v43 = vmul.f32 %v1186_v34, %v1186_v34  ;;  %v1191_v40 = vmul.f32 %v1187_v35, %v1187_v35 }
 0x58b   :  { %v1192_v39 = vadd.f32 %v1189_v37, %v1188_v36 }
 0x58d   :  { %v1193_v42 = vadd.f32 %v1192_v39, %v1190_v43 }
 0x58f   :  { %v1194_v44 = vadd.f32 %v1193_v42, %v1191_v40 }
 0x591   :  { %1195 = vadd.xlane.f32.xlu0 %v1194_v44 }
 0x61e   :  { %v1196_v45 = vpop.xlane.xlu0 %1195 }
 0x61f   :  { %v1197_v46 = vmul.f32 0.001953125, %v1196_v45 }
 0x621   :  { %v1199_v47 = vadd.f32 1e-05, %v1197_v46 }
 0x623   :  { %1336 = vrsqrt.f32 %v1199_v47 }
 0x62d   :  { %v1337_v49 = vpop.eup %1336 }
 0x62e   :  { %v1201_v50 = vmul.f32 %v1337_v49, %v1198_v48 }
 0x630   :  { %1207 = vperm.xlu0 %1332, %v1201_v50   ;;  %v1203_v52 = vmul.f32 %v1201_v50, %v1183_v41 }
 0x632   :  { %v1204_v53 = vsub.f32 %v1202_v51, %v1203_v52 }
 0x634   :  { %1216 = vperm.xlu1 %1333, %v1204_v53  }
 0x6af   :  { %v1208_v54 = vpop.permute.xlu0 %1207 }
 0x6b0   :  { %v1210_v55 = vmul.f32 %v1208_v54, %v1103_v23  ;;  %v1211_v56 = vmul.f32 %v1208_v54, %v1105_v25  ;;  %v1212_v57 = vmul.f32 %v1208_v54, %v1174_v28  ;;  %v1213_v1 = vmul.f32 %v1208_v54, %v1176_v9 }
 0x6b3   :  { %v1217_v58 = vpop.permute.xlu1 %1216 }
 0x6b4   :  { %v1219_v59 = vadd.f32 %v1217_v58, %v1210_v55  ;;  %v1220_v60 = vadd.f32 %v1217_v58, %v1211_v56  ;;  %v1221_v61 = vadd.f32 %v1217_v58, %v1212_v57  ;;  %v1222_v62 = vadd.f32 %v1217_v58, %v1213_v1 }
 0x6b6   :  { %v1223_v5 = vadd.f32 %v1338_v63, %v1219_v59  ;;  %v1224_v2 = vadd.f32 %v1339_v0, %v1220_v60  ;;  %v1225_v3 = vadd.f32 %v1340_v6, %v1221_v61  ;;  %v1226_v8 = vadd.f32 %v1341_v7, %v1222_v62 }
 0x6b8   :  { %v1227_v11 = vmax.f32 %v1223_v5, 0.0  ;;  %v1228_v4 = vmax.f32 %v1224_v2, 0.0  ;;  %v1229_v12 = vmax.f32 %v1225_v3, 0.0  ;;  %v1230_v10 = vmax.f32 %v1226_v8, 0.0 }
 0x6ba   :  { %1231 = vst [vmem:[#allocation6] sm:$0xff] %v1227_v11  ;;  %1232 = vst [vmem:[#allocation6 + $0x8] sm:$0xff] %v1228_v4 }
 0x6bb   :  { %1233 = vst [vmem:[#allocation6 + $0x10] sm:$0xff] %v1229_v12  ;;  %1234 = vst [vmem:[#allocation6 + $0x18] sm:$0xff] %v1230_v10 }
 0x6bc   :  { %1375 = shalt.err (!%p1372_p12)
}
 0x6bd   :  { %s1376_s0 = scalar_lea.hbm %s1911_s10, 512 }
 0x6be   :  { %p1377_p13 = scmp.ne.s32.totalorder %s1911_s10, %s1376_s0  ;;  %p1380_p0 = scmp.lt.u32.totalorder %s1376_s0, %s1911_s10 }
 0x6c0   :  { %p1382_p1 = pnand %p1380_p0, %p1377_p13 }
 0x6c2   :  { %1385 = shalt.err (!%p1382_p1)
}
 0x6c3   :  { %1244 = dma.vmem_to_hbm [thread:$0]  %s1242_s12, 512, %s1911_s10, [#allocation5]  }
 0x6c4   :  { %1388 = dma.done.wait [#allocation5], 512  }
 0x6c5   :  { %1389 = vsyncadd [#allocation5], 4294966784 }
 0x6c6   :  { %1248 = vsyncpa [#allocation4], 1 }
 0x6c7   :  { %1249 = vsyncpa [#allocation5], 1 }

</bundles_post_ra>
